<compile_context>
chip_gen: v7x
topology: tpu7x:2x2x1
jax: 0.10.0
libtpu: 0.0.40
codegen_flags: <defaults>
</compile_context>

<pallas_src>
import functools

import jax
import jax.numpy as jnp
from jax.experimental import pallas as pl
from jax.experimental.pallas import tpu as pltpu

LANE = 128


def _round_up(x: int, m: int) -> int:
    return ((x + m - 1) // m) * m


def feedforward_kernel(x_ref, w1_ref, b1_ref, w2_ref, b2_ref, o_ref, acc_ref):
    # x_ref : (tm, Dp)   w1_ref: (Dp, th)   b1_ref: (1, th)
    # w2_ref: (th, Dp)   b2_ref: (1, Dp)
    # o_ref : (tm, Dp)   acc_ref: (tm, Dp) f32 accumulator, resident across the k axis
    k = pl.program_id(1)

    @pl.when(k == 0)
    def _init():
        acc_ref[...] = jnp.zeros_like(acc_ref)

    x = x_ref[...]
    a = jnp.maximum(x, 0)                                        # activation(x), model dtype
    h = jnp.dot(a, w1_ref[...], preferred_element_type=jnp.float32)   # linear1 (partial cols)
    h = jnp.maximum(h + b1_ref[...].astype(jnp.float32), 0.0)         # + bias, activation (f32)
    acc_ref[...] += jnp.dot(h.astype(w2_ref.dtype), w2_ref[...],
                            preferred_element_type=jnp.float32)       # linear2 partial sum

    @pl.when(k == pl.num_programs(1) - 1)
    def _finalize():
        y = acc_ref[...] + b2_ref[...].astype(jnp.float32) + x.astype(jnp.float32)
        o_ref[...] = y.astype(o_ref.dtype)

    # TODO(synk): dropout / LayerNorm branches of the module are disabled by default
    # (dropout=None, normalize=False) and are not emitted here.


@functools.partial(jax.jit, static_argnames=("tm", "th", "vmem_limit_bytes"))
def feedforward(x, w1, b1, w2, b2, *, tm=256, th=512,
                vmem_limit_bytes=64 * 1024 * 1024):
    N, D = x.shape
    H = w1.shape[1]

    # Sublane granularity depends on dtype packing (f32: 8 rows/vreg, bf16: 16).
    sub = 16 if x.dtype == jnp.bfloat16 else 8

    Dp = _round_up(D, LANE)
    Hp = _round_up(H, LANE)

    tm_eff = _round_up(min(tm, _round_up(N, sub)), sub)   # don't over-pad tiny N
    Np = _round_up(N, tm_eff)

    th_eff = _round_up(min(th, Hp), LANE)
    Hp = _round_up(Hp, th_eff)

    # Zero-pad to hardware-friendly shapes (zeros contribute nothing through the MLP
    # and padded rows/cols are sliced off below).
    xp = jnp.zeros((Np, Dp), x.dtype).at[:N, :D].set(x)
    w1p = jnp.zeros((Dp, Hp), w1.dtype).at[:D, :H].set(w1)
    b1p = jnp.zeros((1, Hp), b1.dtype).at[:, :H].set(b1.reshape(1, H))
    w2p = jnp.zeros((Hp, Dp), w2.dtype).at[:H, :D].set(w2)
    b2p = jnp.zeros((1, Dp), b2.dtype).at[:, :D].set(b2.reshape(1, D))

    grid = (Np // tm_eff, Hp // th_eff)   # rows parallel, hidden-dim reduction last

    out = pl.pallas_call(
        feedforward_kernel,
        out_shape=jax.ShapeDtypeStruct((Np, Dp), x.dtype),
        grid_spec=pltpu.PrefetchScalarGridSpec(
            num_scalar_prefetch=0,
            grid=grid,
            in_specs=[
                pl.BlockSpec((tm_eff, Dp), lambda i, k: (i, 0)),   # x tile (resident over k)
                pl.BlockSpec((Dp, th_eff), lambda i, k: (0, k)),   # W1 column block (streamed)
                pl.BlockSpec((1, th_eff), lambda i, k: (0, k)),    # b1 block
                pl.BlockSpec((th_eff, Dp), lambda i, k: (k, 0)),   # W2 row block (streamed)
                pl.BlockSpec((1, Dp), lambda i, k: (0, 0)),        # b2 (constant)
            ],
            out_specs=pl.BlockSpec((tm_eff, Dp), lambda i, k: (i, 0)),
            scratch_shapes=[pltpu.VMEM((tm_eff, Dp), jnp.float32)],
        ),
        compiler_params=pltpu.CompilerParams(
            dimension_semantics=("parallel", "arbitrary"),
            vmem_limit_bytes=vmem_limit_bytes,
        ),
    )(xp, w1p, b1p, w2p, b2p)

    return out[:N, :D]


def init_params(key, input_size, hidden_units):
    # VarianceScalingNormalInitializer ~ normal with std = sqrt(scale / fan_in),
    # scale=1.0 (fan_in mode).  Biases -> zeros (bias_initializer=nn.init.zeros_).
    k1, k2 = jax.random.split(key)
    w1 = jax.random.normal(k1, (input_size, hidden_units), jnp.float32) * (
        1.0 / jnp.sqrt(input_size))
    b1 = jnp.zeros((1, hidden_units), jnp.float32)
    w2 = jax.random.normal(k2, (hidden_units, input_size), jnp.float32) * (
        1.0 / jnp.sqrt(hidden_units))
    b2 = jnp.zeros((1, input_size), jnp.float32)
    return w1, b1, w2, b2


if __name__ == "__main__":
    key = jax.random.PRNGKey(0)
    kx, kp = jax.random.split(key)

    input_size = 32
    hidden_units = 2 * input_size   # module default
    N = 16                          # number of "tokens" / rows

    x = jax.random.normal(kx, (N, input_size), jnp.float32)
    w1, b1, w2, b2 = init_params(kp, input_size, hidden_units)

    out = jax.block_until_ready(feedforward(x, w1, b1, w2, b2))

    # pure-JAX reference check
    h = jnp.maximum(x, 0.0)
    h = jnp.maximum(h @ w1 + b1, 0.0)
    ref = h @ w2 + b2 + x
    assert out.shape == ref.shape
    assert jnp.allclose(out, ref, atol=1e-5, rtol=1e-5), "mismatch vs reference"

    print("KERNEL_OK")
</pallas_src>

<mosaic_0001>
module attributes {stable_mosaic.version = 11 : i64} {
  func.func @feedforward_kernel(%arg0: i32, %arg1: i32, %arg2: memref<16x128xf32, #tpu.memory_space<vmem>>, %arg3: memref<128x128xf32, #tpu.memory_space<vmem>>, %arg4: memref<1x128xf32, #tpu.memory_space<vmem>>, %arg5: memref<128x128xf32, #tpu.memory_space<vmem>>, %arg6: memref<1x128xf32, #tpu.memory_space<vmem>>, %arg7: memref<16x128xf32, #tpu.memory_space<vmem>>, %arg8: memref<16x128xf32, #tpu.memory_space<vmem>>) attributes {dimension_semantics = [#tpu.dimension_semantics<parallel>, #tpu.dimension_semantics<arbitrary>], iteration_bounds = array<i64: 1, 1>, scalar_prefetch = 0 : i64, scratch_operands = 1 : i64, tpu.core_type = #tpu.core_type<tc>, window_params = [{transform_indices = @transform_0, window_bounds = array<i64: 16, 128>}, {transform_indices = @transform_1, window_bounds = array<i64: 128, 128>}, {transform_indices = @transform_2, window_bounds = array<i64: 1, 128>}, {transform_indices = @transform_3, window_bounds = array<i64: 128, 128>}, {pipeline_mode = #tpu.pipeline_mode<synchronous>, transform_indices = @transform_4, window_bounds = array<i64: 1, 128>}, {transform_indices = @transform_5, window_bounds = array<i64: 16, 128>}]} {
    %c0_i32 = arith.constant 0 : i32
    %0 = arith.cmpi eq, %arg1, %c0_i32 : i32
    %1 = arith.extui %0 : i1 to i32
    %c0_i32_0 = arith.constant 0 : i32
    %2 = arith.cmpi ne, %1, %c0_i32_0 : i32
    scf.if %2 {
      %cst_17 = arith.constant 0.000000e+00 : f32
      %21 = vector.broadcast %cst_17 : f32 to vector<16x128xf32>
      %c0_18 = arith.constant 0 : index
      %c0_19 = arith.constant 0 : index
      %22 = vector.load %arg8[%c0_18, %c0_19] : memref<16x128xf32, #tpu.memory_space<vmem>>, vector<16x128xf32>
      tpu.vector_store %arg8[%c0_18, %c0_19], %21 {strides = array<i32>} : memref<16x128xf32, #tpu.memory_space<vmem>>, vector<16x128xf32>,
    } else {
    }
    %c0 = arith.constant 0 : index
    %c0_1 = arith.constant 0 : index
    %3 = vector.load %arg2[%c0, %c0_1] : memref<16x128xf32, #tpu.memory_space<vmem>>, vector<16x128xf32>
    %cst = arith.constant 0.000000e+00 : f32
    %4 = vector.broadcast %cst : f32 to vector<16x128xf32>
    %5 = arith.maximumf %3, %4 : vector<16x128xf32>
    %c0_2 = arith.constant 0 : index
    %c0_3 = arith.constant 0 : index
    %6 = vector.load %arg3[%c0_2, %c0_3] : memref<128x128xf32, #tpu.memory_space<vmem>>, vector<128x128xf32>
    %cst_4 = arith.constant dense<0.000000e+00> : vector<16x128xf32>
    %7 = tpu.matmul %5, %6, %cst_4 {dimension_numbers = #tpu.dot_dimension_numbers<[1], [0], [0], [1], [0, 0, 1, 1], [], []>} : vector<16x128xf32>, vector<128x128xf32>, vector<16x128xf32> -> vector<16x128xf32>
    %c0_5 = arith.constant 0 : index
    %c0_6 = arith.constant 0 : index
    %8 = vector.load %arg4[%c0_5, %c0_6] : memref<1x128xf32, #tpu.memory_space<vmem>>, vector<1x128xf32>
    %9 = vector.broadcast %8 : vector<1x128xf32> to vector<16x128xf32>
    %10 = arith.addf %7, %9 : vector<16x128xf32>
    %cst_7 = arith.constant 0.000000e+00 : f32
    %11 = vector.broadcast %cst_7 : f32 to vector<16x128xf32>
    %12 = arith.maximumf %10, %11 : vector<16x128xf32>
    %c0_8 = arith.constant 0 : index
    %c0_9 = arith.constant 0 : index
    %13 = vector.load %arg8[%c0_8, %c0_9] : memref<16x128xf32, #tpu.memory_space<vmem>>, vector<16x128xf32>
    %c0_10 = arith.constant 0 : index
    %c0_11 = arith.constant 0 : index
    %14 = vector.load %arg5[%c0_10, %c0_11] : memref<128x128xf32, #tpu.memory_space<vmem>>, vector<128x128xf32>
    %cst_12 = arith.constant dense<0.000000e+00> : vector<16x128xf32>
    %15 = tpu.matmul %12, %14, %cst_12 {dimension_numbers = #tpu.dot_dimension_numbers<[1], [0], [0], [1], [0, 0, 1, 1], [], []>} : vector<16x128xf32>, vector<128x128xf32>, vector<16x128xf32> -> vector<16x128xf32>
    %16 = arith.addf %13, %15 : vector<16x128xf32>
    %c0_13 = arith.constant 0 : index
    %c0_14 = arith.constant 0 : index
    %17 = vector.load %arg8[%c0_13, %c0_14] : memref<16x128xf32, #tpu.memory_space<vmem>>, vector<16x128xf32>
    tpu.vector_store %arg8[%c0_13, %c0_14], %16 {strides = array<i32>} : memref<16x128xf32, #tpu.memory_space<vmem>>, vector<16x128xf32>,
    %c0_i32_15 = arith.constant 0 : i32
    %18 = arith.cmpi eq, %arg1, %c0_i32_15 : i32
    %19 = arith.extui %18 : i1 to i32
    %c0_i32_16 = arith.constant 0 : i32
    %20 = arith.cmpi ne, %19, %c0_i32_16 : i32
    scf.if %20 {
      %c0_17 = arith.constant 0 : index
      %c0_18 = arith.constant 0 : index
      %21 = vector.load %arg8[%c0_17, %c0_18] : memref<16x128xf32, #tpu.memory_space<vmem>>, vector<16x128xf32>
      %c0_19 = arith.constant 0 : index
      %c0_20 = arith.constant 0 : index
      %22 = vector.load %arg6[%c0_19, %c0_20] : memref<1x128xf32, #tpu.memory_space<vmem>>, vector<1x128xf32>
      %23 = vector.broadcast %22 : vector<1x128xf32> to vector<16x128xf32>
      %24 = arith.addf %21, %23 : vector<16x128xf32>
      %25 = arith.addf %24, %3 : vector<16x128xf32>
      %c0_21 = arith.constant 0 : index
      %c0_22 = arith.constant 0 : index
      %26 = vector.load %arg7[%c0_21, %c0_22] : memref<16x128xf32, #tpu.memory_space<vmem>>, vector<16x128xf32>
      tpu.vector_store %arg7[%c0_21, %c0_22], %25 {strides = array<i32>} : memref<16x128xf32, #tpu.memory_space<vmem>>, vector<16x128xf32>,
    } else {
    }
    return
  }
  func.func @transform_0(%arg0: i32, %arg1: i32) -> (i32, i32) {
    %c0_i32 = arith.constant 0 : i32
    %c0_i32_0 = arith.constant 0 : i32
    return %arg0, %c0_i32 : i32, i32
  }
  func.func @transform_1(%arg0: i32, %arg1: i32) -> (i32, i32) {
    %c0_i32 = arith.constant 0 : i32
    %c0_i32_0 = arith.constant 0 : i32
    return %c0_i32, %arg1 : i32, i32
  }
  func.func @transform_2(%arg0: i32, %arg1: i32) -> (i32, i32) {
    %c0_i32 = arith.constant 0 : i32
    %c0_i32_0 = arith.constant 0 : i32
    return %c0_i32, %arg1 : i32, i32
  }
  func.func @transform_3(%arg0: i32, %arg1: i32) -> (i32, i32) {
    %c0_i32 = arith.constant 0 : i32
    %c0_i32_0 = arith.constant 0 : i32
    return %arg1, %c0_i32 : i32, i32
  }
  func.func @transform_4(%arg0: i32, %arg1: i32) -> (i32, i32) {
    %c0_i32 = arith.constant 0 : i32
    %c0_i32_0 = arith.constant 0 : i32
    %c0_i32_1 = arith.constant 0 : i32
    return %c0_i32, %c0_i32_0 : i32, i32
  }
  func.func @transform_5(%arg0: i32, %arg1: i32) -> (i32, i32) {
    %c0_i32 = arith.constant 0 : i32
    %c0_i32_0 = arith.constant 0 : i32
    return %arg0, %c0_i32 : i32, i32
  }
}

</mosaic_0001>

<bundles_post_ra>
// kernel: feedforward.1
= control target key start
LH: loop header
LB: loop body
LE: loop exit
PB: predicated region body
PF: predicated region fallthrough
CT: control target
= control target key end

     0   :  { %10 = vsyncpa [#allocation4], 0  ;;  %s782_s0 = inlined_call_operand.hbm [shape: f32[16,128], index: 0, kind: input, shape index: {}]   ;;  %s783_s1 = inlined_call_operand.hbm [shape: f32[128,128], index: 1, kind: input, shape index: {}]   ;;  %s784_s2 = inlined_call_operand.hbm [shape: f32[1,128], index: 2, kind: input, shape index: {}]   ;;  %s785_s3 = inlined_call_operand.hbm [shape: f32[128,128], index: 3, kind: input, shape index: {}]   ;;  %s786_s4 = inlined_call_operand.hbm [shape: f32[1,128], index: 4, kind: input, shape index: {}]   ;;  %s787_s5 = inlined_call_operand.hbm [shape: f32[16,128], index: 5, kind: output, shape index: {}]  }
   0x1   :  { %11 = vsyncpa [#allocation7], 0 }
   0x2   :  { %12 = vsyncpa [#allocation10], 0 }
   0x3   :  { %13 = vsyncpa [#allocation5], 0  ;;  %s649_s18 = smov [#allocation6]   ;;  %s650_s20 = smov [#allocation9]  }
   0x4   :  { %s31_s19 = sshll.u32 %s649_s18, 4  ;;  %s53_s21 = sshll.u32 %s650_s20, 4  ;;  %s32_s19 = int_to_ptr.vmem [resolvable:$true] %s31_s19  ;;  %s687_s21 = int_to_ptr.vmem [resolvable:$true] %s53_s21 }
   0x5   :  { %s509_s24 = scalar_lea.hbm %s783_s1, 2048 }
   0x6   :  { %p510_p0 = scmp.ne.s32.totalorder %s783_s1, %s509_s24  ;;  %p513_p1 = scmp.lt.u32.totalorder %s509_s24, %s783_s1 }
   0x8   :  { %p515_p2 = pnand %p513_p1, %p510_p0 }
   0xa   :  { %518 = shalt.err (!%p515_p2)
}
   0xb   :  { %s519_s29 = scalar_lea.vmem %s32_s19, 2048  ;;  %p524_p4 = scmp.lt.s32.totalorder %s32_s19, %s32_s19 }
   0xc   :  { %p520_p3 = scmp.ne.s32.totalorder %s32_s19, %s519_s29  ;;  %p525_p5 = scmp.lt.s32.totalorder %s519_s29, %s519_s29 }
   0xe   :  { %p526_p6 = por %p525_p5, %p524_p4 }
  0x10   :  { %p527_p7 = pnand %p526_p6, %p520_p3 }
  0x12   :  { %530 = shalt.err (!%p527_p7)
}
  0x13   :  { %s651_s30 = smov 128   ;;  %s652_s6 = smov 8  }
  0x14   :  { %37 = dma.hbm_to_vmem [thread:$0]  %s783_s1, 2048, %s32_s19, [#allocation7], %s651_s30, %s651_s30, %s652_s6  }
  0x15   :  { %s531_s11 = scalar_lea.hbm %s785_s3, 2048 }
  0x16   :  { %p532_p8 = scmp.ne.s32.totalorder %s785_s3, %s531_s11  ;;  %p535_p9 = scmp.lt.u32.totalorder %s531_s11, %s785_s3 }
  0x18   :  { %p537_p10 = pnand %p535_p9, %p532_p8 }
  0x1a   :  { %540 = shalt.err (!%p537_p10)
}
  0x1b   :  { %s541_s16 = scalar_lea.vmem %s687_s21, 2048  ;;  %p546_p12 = scmp.lt.s32.totalorder %s687_s21, %s687_s21 }
  0x1c   :  { %p542_p11 = scmp.ne.s32.totalorder %s687_s21, %s541_s16  ;;  %p547_p13 = scmp.lt.s32.totalorder %s541_s16, %s541_s16 }
  0x1e   :  { %p548_p0 = por %p547_p13, %p546_p12 }
  0x20   :  { %p549_p1 = pnand %p548_p0, %p542_p11 }
  0x22   :  { %552 = shalt.err (!%p549_p1)
}
  0x23   :  { %59 = dma.hbm_to_vmem [thread:$0]  %s785_s3, 2048, %s687_s21, [#allocation10], %s651_s30, %s651_s30, %s652_s6  }
  0x24   :  { %s653_s18 = smov [#allocation3]   ;;  %s654_s20 = smov [#allocation8]  }
  0x25   :  { %s19_s19 = sshll.u32 %s653_s18, 4  ;;  %s44_s22 = sshll.u32 %s654_s20, 4  ;;  %s20_s19 = int_to_ptr.vmem [resolvable:$true] %s19_s19  ;;  %s45_s22 = int_to_ptr.vmem [resolvable:$true] %s44_s22 }
  0x26   :  { %s553_s25 = scalar_lea.hbm %s782_s0, 256 }
  0x27   :  { %p554_p2 = scmp.ne.s32.totalorder %s782_s0, %s553_s25  ;;  %p557_p3 = scmp.lt.u32.totalorder %s553_s25, %s782_s0 }
  0x29   :  { %p559_p4 = pnand %p557_p3, %p554_p2 }
  0x2b   :  { %562 = shalt.err (!%p559_p4)
}
  0x2c   :  { %s563_s3 = scalar_lea.vmem %s20_s19, 256  ;;  %p568_p6 = scmp.lt.s32.totalorder %s20_s19, %s20_s19 }
  0x2d   :  { %p564_p5 = scmp.ne.s32.totalorder %s20_s19, %s563_s3  ;;  %p569_p7 = scmp.lt.s32.totalorder %s563_s3, %s563_s3 }
  0x2f   :  { %p570_p8 = por %p569_p7, %p568_p6 }
  0x31   :  { %p571_p9 = pnand %p570_p8, %p564_p5 }
  0x33   :  { %574 = shalt.err (!%p571_p9)
}
  0x34   :  { %25 = dma.hbm_to_vmem [thread:$0]  %s782_s0, 256, %s20_s19, [#allocation4], %s651_s30, %s651_s30, %s652_s6  }
  0x35   :  { %s575_s10 = scalar_lea.hbm %s784_s2, 16 }
  0x36   :  { %p576_p10 = scmp.ne.s32.totalorder %s784_s2, %s575_s10  ;;  %p579_p11 = scmp.lt.u32.totalorder %s575_s10, %s784_s2 }
  0x38   :  { %p581_p12 = pnand %p579_p11, %p576_p10 }
  0x3a   :  { %584 = shalt.err (!%p581_p12)
}
  0x3b   :  { %s585_s15 = scalar_lea.vmem %s45_s22, 16  ;;  %s589_s16 = scalar_lea.vmem %s45_s22, 32 }
  0x3c   :  { %p586_p13 = scmp.ne.s32.totalorder %s45_s22, %s585_s15  ;;  %p590_p0 = scmp.lt.s32.totalorder %s45_s22, %s45_s22 }
  0x3d   :  { %p591_p1 = scmp.lt.s32.totalorder %s589_s16, %s585_s15 }
  0x3f   :  { %p592_p2 = por %p591_p1, %p590_p0 }
  0x41   :  { %p593_p3 = pnand %p592_p2, %p586_p13 }
  0x43   :  { %596 = shalt.err (!%p593_p3)
}
  0x44   :  { %47 = dma.hbm_to_vmem [thread:$0]  %s784_s2, 16, %s45_s22, [#allocation7]  }
  0x45   :  { %s655_s17 = smov [#allocation11]   ;;  %s597_s23 = scalar_lea.hbm %s786_s4, 16 }
  0x46   :  { %s66_s18 = sshll.u32 %s655_s17, 4  ;;  %p598_p4 = scmp.ne.s32.totalorder %s786_s4, %s597_s23  ;;  %s67_s18 = int_to_ptr.vmem [resolvable:$true] %s66_s18 }
  0x47   :  { %p601_p5 = scmp.lt.u32.totalorder %s597_s23, %s786_s4 }
  0x49   :  { %p603_p6 = pnand %p601_p5, %p598_p4 }
  0x4b   :  { %606 = shalt.err (!%p603_p6)
}
  0x4c   :  { %s607_s28 = scalar_lea.vmem %s67_s18, 16  ;;  %s611_s2 = scalar_lea.vmem %s67_s18, 32 }
  0x4d   :  { %p608_p7 = scmp.ne.s32.totalorder %s67_s18, %s607_s28  ;;  %p612_p8 = scmp.lt.s32.totalorder %s67_s18, %s67_s18 }
  0x4e   :  { %p613_p9 = scmp.lt.s32.totalorder %s611_s2, %s607_s28 }
  0x50   :  { %p614_p10 = por %p613_p9, %p612_p8 }
  0x52   :  { %p615_p11 = pnand %p614_p10, %p608_p7 }
  0x54   :  { %618 = shalt.err (!%p615_p11)
}
  0x55   :  { %69 = dma.hbm_to_vmem [thread:$0]  %s786_s4, 16, %s67_s18, [#allocation10]  }
  0x56   :  { %641 = dma.done.wait [#allocation4], 256  }
  0x57   :  { %642 = vsyncadd [#allocation4], 4294967040 }
  0x58   :  { %643 = dma.done.wait [#allocation7], 2064  }
  0x59   :  { %644 = vsyncadd [#allocation7], 4294965232 }
  0x5a   :  { %645 = dma.done.wait [#allocation10], 2064  }
  0x5b   :  { %646 = vsyncadd [#allocation10], 4294965232  ;;  %v95_v0 = vld [vmem:[#allocation6] sm:$0xff]  ;;  %v96_v1 = vld [vmem:[#allocation6 + $0x8] sm:$0xff]  ;;  %s656_s4 = smov [#allocation12]  }
  0x5c   :  { %v97_v2 = vld [vmem:[#allocation6 + $0x10] sm:$0xff]  ;;  %v437_v3 = vpack.c.bf16 %v96_v1, %v95_v0  ;;  %v98_v4 = vld [vmem:[#allocation6 + $0x18] sm:$0xff]  ;;  %v99_v6 = vld [vmem:[#allocation6 + $0x20] sm:$0xff]  ;;  %s315_s3 = sshll.u32 %s656_s4, 4  ;;  %s316_s3 = int_to_ptr.vmem [resolvable:$true] %s315_s3 }
  0x5d   :  { %v441_v5 = vpack.c.bf16 %v98_v4, %v97_v2  ;;  %v100_v7 = vld [vmem:[#allocation6 + $0x28] sm:$0xff]  ;;  %v101_v9 = vld [vmem:[#allocation6 + $0x30] sm:$0xff]  ;;  %v102_v10 = vld [vmem:[#allocation6 + $0x38] sm:$0xff]  ;;  %s619_s21 = scalar_lea.vmem %s316_s3, 256  ;;  %p624_p13 = scmp.lt.s32.totalorder %s316_s3, %s316_s3 }
  0x5e   :  { %438 = vmatprep.subr.bf16.mxu0 %v437_v3  ;;  %v445_v8 = vpack.c.bf16 %v100_v7, %v99_v6  ;;  %v763_v11 = vld [vmem:[#allocation3] sm:$0xff]  ;;  %v197_v13 = vld [vmem:[#allocation9] sm:$0xff]  ;;  %v200_v17 = vld [vmem:[#allocation9 + $0x18] sm:$0xff]  ;;  %v449_v21 = vpack.c.bf16 %v102_v10, %v101_v9  ;;  %p620_p12 = scmp.ne.s32.totalorder %s316_s3, %s619_s21  ;;  %p625_p0 = scmp.lt.s32.totalorder %s619_s21, %s619_s21 }
  0x5f   :  { %440 = vmatpush3.bf16.msra.mxu0 %v437_v3  ;;  %v93_v12 = vmax.f32 %v763_v11, 0.0  ;;  %v198_v14 = vld [vmem:[#allocation9 + $0x8] sm:$0xff]  ;;  %v199_v15 = vld [vmem:[#allocation9 + $0x10] sm:$0xff]  ;;  %v201_v19 = vld [vmem:[#allocation9 + $0x20] sm:$0xff] }
  0x60   :  { %442 = vmatprep.subr.bf16.mxu0 %v441_v5  ;;  %v469_v16 = vpack.c.bf16 %v198_v14, %v197_v13  ;;  %v473_v18 = vpack.c.bf16 %v200_v17, %v199_v15  ;;  %v202_v20 = vld [vmem:[#allocation9 + $0x28] sm:$0xff]  ;;  %v103_v22 = vld [vmem:[#allocation6 + $0x40] sm:$0xff]  ;;  %v203_v25 = vld [vmem:[#allocation9 + $0x30] sm:$0xff]  ;;  %p626_p1 = por %p625_p0, %p624_p13 }
  0x61   :  { %399 = vmatprep.mubr.f32.mxu0 %v93_v12  ;;  %v104_v23 = vld [vmem:[#allocation6 + $0x48] sm:$0xff]  ;;  %v477_v24 = vpack.c.bf16 %v202_v20, %v201_v19  ;;  %v204_v26 = vld [vmem:[#allocation9 + $0x38] sm:$0xff]  ;;  %v105_v28 = vld [vmem:[#allocation6 + $0x50] sm:$0xff] }
  0x62   :  { %470 = vmatprep.subr.bf16.mxu1 %v469_v16  ;;  %v453_v27 = vpack.c.bf16 %v104_v23, %v103_v22  ;;  %v106_v29 = vld [vmem:[#allocation6 + $0x58] sm:$0xff]  ;;  %v481_v30 = vpack.c.bf16 %v204_v26, %v203_v25  ;;  %v205_v31 = vld [vmem:[#allocation9 + $0x40] sm:$0xff]  ;;  %v206_v32 = vld [vmem:[#allocation9 + $0x48] sm:$0xff]  ;;  %p627_p2 = pnand %p626_p1, %p620_p12 }
  0x63   :  { %444 = vmatpush3.bf16.msra.mxu0 %v441_v5  ;;  %472 = vmatpush3.bf16.msra.mxu1 %v469_v16  ;;  %v457_v33 = vpack.c.bf16 %v106_v29, %v105_v28  ;;  %v107_v34 = vld [vmem:[#allocation6 + $0x60] sm:$0xff]  ;;  %v108_v35 = vld [vmem:[#allocation6 + $0x68] sm:$0xff]  ;;  %v485_v36 = vpack.c.bf16 %v206_v32, %v205_v31  ;;  %v207_v37 = vld [vmem:[#allocation9 + $0x50] sm:$0xff] }
  0x64   :  { %446 = vmatprep.subr.bf16.mxu0 %v445_v8  ;;  %474 = vmatprep.subr.bf16.mxu1 %v473_v18  ;;  %v208_v38 = vld [vmem:[#allocation9 + $0x58] sm:$0xff]  ;;  %v461_v39 = vpack.c.bf16 %v108_v35, %v107_v34  ;;  %v109_v40 = vld [vmem:[#allocation6 + $0x70] sm:$0xff]  ;;  %v209_v43 = vld [vmem:[#allocation9 + $0x60] sm:$0xff] }
  0x65   :  { %v110_v41 = vld [vmem:[#allocation6 + $0x78] sm:$0xff]  ;;  %v489_v42 = vpack.c.bf16 %v208_v38, %v207_v37  ;;  %v210_v44 = vld [vmem:[#allocation9 + $0x68] sm:$0xff]  ;;  %v329_v52 = vld [vmem:[#allocation8] ss:$0 sm:$0xff] }
  0x66   :  { %v465_v45 = vpack.c.bf16 %v110_v41, %v109_v40  ;;  %v493_v46 = vpack.c.bf16 %v210_v44, %v209_v43  ;;  %v92_v47 = vld [vmem:[#allocation3 + $0x8] sm:$0xff]  ;;  %v330_v59 = vld [vmem:[#allocation11] ss:$0 sm:$0xff] }
  0x67   :  { %448 = vmatpush3.bf16.msra.mxu0 %v445_v8  ;;  %476 = vmatpush3.bf16.msra.mxu1 %v473_v18  ;;  %v94_v48 = vmax.f32 %v92_v47, 0.0  ;;  %v211_v49 = vld [vmem:[#allocation9 + $0x70] sm:$0xff]  ;;  %v212_v50 = vld [vmem:[#allocation9 + $0x78] sm:$0xff] }
  0x68   :  { %450 = vmatprep.subr.bf16.mxu0 %v449_v21  ;;  %478 = vmatprep.subr.bf16.mxu1 %v477_v24  ;;  %v497_v51 = vpack.c.bf16 %v212_v50, %v211_v49 }
  0x6b   :  { %452 = vmatpush3.bf16.msra.mxu0 %v449_v21  ;;  %480 = vmatpush3.bf16.msra.mxu1 %v477_v24 }
  0x6c   :  { %454 = vmatprep.subr.bf16.mxu0 %v453_v27  ;;  %482 = vmatprep.subr.bf16.mxu1 %v481_v30 }
  0x6f   :  { %456 = vmatpush3.bf16.msra.mxu0 %v453_v27  ;;  %484 = vmatpush3.bf16.msra.mxu1 %v481_v30 }
  0x70   :  { %458 = vmatprep.subr.bf16.mxu0 %v457_v33  ;;  %486 = vmatprep.subr.bf16.mxu1 %v485_v36 }
  0x73   :  { %460 = vmatpush3.bf16.msra.mxu0 %v457_v33  ;;  %488 = vmatpush3.bf16.msra.mxu1 %v485_v36 }
  0x74   :  { %462 = vmatprep.subr.bf16.mxu0 %v461_v39  ;;  %490 = vmatprep.subr.bf16.mxu1 %v489_v42 }
  0x77   :  { %464 = vmatpush3.bf16.msra.mxu0 %v461_v39  ;;  %492 = vmatpush3.bf16.msra.mxu1 %v489_v42 }
  0x78   :  { %466 = vmatprep.subr.bf16.mxu0 %v465_v45  ;;  %494 = vmatprep.subr.bf16.mxu1 %v493_v46 }
  0x7b   :  { %468 = vmatpush3.bf16.msra.mxu0 %v465_v45  ;;  %496 = vmatpush3.bf16.msra.mxu1 %v493_v46 }
  0x7c   :  { %498 = vmatprep.subr.bf16.mxu1 %v497_v51 }
  0x7e   :  { %400 = vmatmul.mubr.f32.vlgmr.msra.gmra.mrb[0].mxu0 %v94_v48 }
  0x7f   :  { %500 = vmatpush3.bf16.msra.mxu1 %v497_v51 }
 0x151   :  { %v401_v53 = vpop.f32.mrb[0].mxu0 }
 0x152   :  { %v190_v54 = vadd.f32 %v401_v53, %v329_v52  ;;  %v184_v55 = vpop.f32.mrb[1].mxu0 }
 0x153   :  { %v185_v56 = vadd.f32 %v329_v52, %v184_v55 }
 0x154   :  { %v194_v58 = vmax.f32 %v190_v54, 0.0 }
 0x155   :  { %v193_v57 = vmax.f32 %v185_v56, 0.0 }
 0x157   :  { %434 = vmatprep.mubr.f32.mxu1 %v193_v57 }
 0x158   :  { %435 = vmatmul.mubr.f32.vlgmr.msra.gmra.mrb[0].mxu1 %v194_v58 }
 0x22b   :  { %v436_v60 = vpop.f32.mrb[0].mxu1 }
 0x22c   :  { %v305_v61 = vadd.f32 %v436_v60, %v330_v59  ;;  %v279_v62 = vpop.f32.mrb[1].mxu1 }
 0x22d   :  { %v304_v63 = vadd.f32 %v330_v59, %v279_v62 }
 0x22e   :  { %v307_v0 = vadd.f32 %v305_v61, %v92_v47 }
 0x22f   :  { %v306_v1 = vadd.f32 %v304_v63, %v763_v11 }
 0x230   :  { %309 = vst [vmem:[#allocation12 + $0x8] sm:$0xff] %v307_v0 }
 0x231   :  { %308 = vst [vmem:[#allocation12] sm:$0xff] %v306_v1 }
 0x232   :  { %630 = shalt.err (!%p627_p2)
}
 0x233   :  { %s631_s9 = scalar_lea.hbm %s787_s5, 256 }
 0x234   :  { %p632_p3 = scmp.ne.s32.totalorder %s787_s5, %s631_s9  ;;  %p635_p4 = scmp.lt.u32.totalorder %s631_s9, %s787_s5 }
 0x236   :  { %p637_p5 = pnand %p635_p4, %p632_p3 }
 0x238   :  { %640 = shalt.err (!%p637_p5)
}
 0x239   :  { %321 = dma.vmem_to_hbm [thread:$0]  %s316_s3, 256, %s787_s5, [#allocation5], %s651_s30, %s651_s30, %s652_s6  }
 0x23a   :  { %647 = dma.done.wait [#allocation5], 256  }
 0x23b   :  { %648 = vsyncadd [#allocation5], 4294967040 }
 0x23c   :  { %325 = vsyncpa [#allocation4], 1 }
 0x23d   :  { %326 = vsyncpa [#allocation7], 1 }
 0x23e   :  { %327 = vsyncpa [#allocation10], 1 }
 0x23f   :  { %328 = vsyncpa [#allocation5], 1 }

</bundles_post_ra>
